<compile_context>
chip_gen: v7x
topology: tpu7x:2x2x1
jax: 0.10.0
libtpu: 0.0.40
codegen_flags: <defaults>
</compile_context>

<pallas_src>
import functools

import jax
import jax.numpy as jnp
from jax.experimental import pallas as pl
from jax.experimental.pallas import tpu as pltpu


def _round_up(n, m):
    return (n + m - 1) // m * m


def _mlp_kernel(n_layers, activation, x_ref, w_ref, b_ref, o_ref):
    """x_ref: [tile_b, pad]; w_ref: [n_layers, pad, pad]; b_ref: [n_layers, 1, pad]."""
    h = x_ref[...].astype(jnp.float32)
    for i in range(n_layers - 1):
        w = w_ref[i]                      # (pad, pad), zero-padded -> exact
        b = b_ref[i]                      # (1, pad),  zero-padded
        h = jnp.dot(h, w, preferred_element_type=jnp.float32) + b
        if activation == "ReLU":
            h = jnp.maximum(h, 0.0)
        elif activation == "sigmoid":
            h = jax.nn.sigmoid(h)
        elif activation == "LeakyReLU":
            # Module explicitly uses negative_slope=0.1 (not the PyTorch 0.01 default).
            h = jnp.where(h >= 0.0, h, 0.1 * h)
        else:
            raise ValueError(f"{activation} not an available activation")
        # nn.Dropout(p=0.0) (module default) is the identity.
        # TODO(synk): for p > 0 sample a keep-mask with pltpu.prng_seed /
        # pltpu.prng_random_bits and scale by 1/(1-p).

    # Scalar head: final weight is stored transposed as a single row, so this is
    # a VPU multiply + lane reduction (no N=1 MXU matmul / result-FIFO pop).
    w_row = w_ref[n_layers - 1, 0:1, :]          # (1, pad)
    b_last = b_ref[n_layers - 1, 0:1, 0:1]       # (1, 1)
    y = jnp.sum(h * w_row, axis=-1, keepdims=True) + b_last
    o_ref[...] = y.astype(o_ref.dtype)


def pack_params(params, n_layers):
    """Pack per-layer (W [in,out], b [1,out]) into zero-padded slabs.

    Hidden layers are stored as [in, out]; the final layer is stored transposed
    as a [1, in] row so the kernel's scalar head runs on the VPU.
    """
    dims = []
    for i, (w, _) in enumerate(params):
        if i < n_layers - 1:
            dims.extend(w.shape)
        else:
            dims.append(w.shape[0])          # transposed row length
    pad = _round_up(max(dims), 8)

    w_slab = jnp.zeros((n_layers, pad, pad), jnp.float32)
    b_slab = jnp.zeros((n_layers, 1, pad), jnp.float32)
    for i, (w, b) in enumerate(params):
        if i < n_layers - 1:
            w_slab = w_slab.at[i, : w.shape[0], : w.shape[1]].set(w)
            b_slab = b_slab.at[i, :, : b.shape[1]].set(b)
        else:
            w_slab = w_slab.at[i, 0:1, : w.shape[0]].set(w.T)
            b_slab = b_slab.at[i, 0:1, 0:1].set(b)
    return w_slab, b_slab, pad


def mlp_forward(x, params, n_layers, activation="ReLU", block_batch=512):
    """params: list of (W [in,out], b [1,out]) per layer; x: [batch, features]."""
    batch, in_features = x.shape
    w_slab, b_slab, pad = pack_params(params, n_layers)

    # Pad features to the slab width (zeros; exact, see kernel notes).
    if in_features < pad:
        x = jnp.pad(x, ((0, 0), (0, pad - in_features)))

    # Batch tile: big enough to amortize the ~0.35us/step overhead, 8-aligned.
    tile_b = min(block_batch, _round_up(batch, 8))
    padded_batch = _round_up(batch, tile_b)
    if padded_batch != batch:
        x = jnp.pad(x, ((0, padded_batch - batch), (0, 0)))

    grid = (padded_batch // tile_b,)
    kernel = functools.partial(_mlp_kernel, n_layers, activation)
    out = pl.pallas_call(
        kernel,
        out_shape=jax.ShapeDtypeStruct((padded_batch, 1), jnp.float32),
        grid=grid,
        in_specs=[
            pl.BlockSpec((tile_b, pad), lambda i: (i, 0)),        # streamed tile
            pl.BlockSpec(w_slab.shape, lambda i: (0, 0, 0)),      # VMEM-resident
            pl.BlockSpec(b_slab.shape, lambda i: (0, 0, 0)),      # VMEM-resident
        ],
        # Output traffic is batch*4 B (negligible vs the input stream), so the
        # module-native (batch, 1) layout is kept.
        # TODO(synk): at very large batch, a lane-dense (tiles, tile_b) output
        # slab (reshaped wrapper-side) avoids masked vst on the store tail.
        out_specs=pl.BlockSpec((tile_b, 1), lambda i: (i, 0)),
        compiler_params=pltpu.CompilerParams(
            dimension_semantics=("parallel",),   # v7x: shard batch over both TCs
        ),
    )(x, w_slab, b_slab)
    return out[:batch]


def init_params(key, input_size, hidden_size, n_layers):
    """Deterministic init mimicking torch.nn.Linear (uniform(-1/sqrt(in), 1/sqrt(in)))."""
    if n_layers == 1:
        sizes = [input_size, 1]
    else:
        sizes = [input_size] + [hidden_size] * (n_layers - 1) + [1]
    params = []
    for i in range(n_layers):
        key, kw, kb = jax.random.split(key, 3)
        fan_in, fan_out = sizes[i], sizes[i + 1]
        bound = 1.0 / (fan_in ** 0.5)
        w = jax.random.uniform(kw, (fan_in, fan_out), jnp.float32, -bound, bound)
        b = jax.random.uniform(kb, (1, fan_out), jnp.float32, -bound, bound)
        params.append((w, b))
    return params, key


def reference_forward(x, params, n_layers, activation="ReLU"):
    h = x
    for i, (w, b) in enumerate(params):
        h = jnp.dot(h, w, precision=jax.lax.Precision.HIGHEST) + b
        if i < n_layers - 1:
            if activation == "ReLU":
                h = jnp.maximum(h, 0.0)
            elif activation == "sigmoid":
                h = jax.nn.sigmoid(h)
            elif activation == "LeakyReLU":
                h = jnp.where(h >= 0.0, h, 0.1 * h)
    return h


if __name__ == "__main__":
    key = jax.random.PRNGKey(0)

    def run_case(batch, input_size, hidden_size, n_layers, activation, key):
        params, key = init_params(key, input_size, hidden_size, n_layers)
        key, kx = jax.random.split(key)
        x = jax.random.uniform(kx, (batch, input_size), jnp.float32, -1.0, 1.0)
        out = jax.block_until_ready(mlp_forward(x, params, n_layers, activation))
        ref = reference_forward(x, params, n_layers, activation)
        assert out.shape == (batch, 1), out.shape
        assert jnp.allclose(out, ref, atol=1e-4, rtol=1e-4), (activation, n_layers, batch)
        return key

    # Small module-scale demos covering all activations.
    for act in ("ReLU", "sigmoid", "LeakyReLU"):
        key = run_case(8, 32, 32, 3, act, key)
    # Single-layer (n_layers == 1) path.
    key = run_case(8, 32, 32, 1, "ReLU", key)
    # NeuralUCB-style scoring of many contexts in one gridded, pipelined call
    # (exercises batch tiling/padding and feature padding: 32 -> 64).
    key = run_case(1000, 32, 64, 3, "ReLU", key)

    print("KERNEL_OK")
</pallas_src>

<mosaic_0001>
module attributes {stable_mosaic.version = 11 : i64} {
  func.func @_mlp_kernel(%arg0: i32, %arg1: memref<8x32xf32, #tpu.memory_space<vmem>>, %arg2: memref<3x32x32xf32, #tpu.memory_space<vmem>>, %arg3: memref<3x1x32xf32, #tpu.memory_space<vmem>>, %arg4: memref<8x1xf32, #tpu.memory_space<vmem>>) attributes {dimension_semantics = [#tpu.dimension_semantics<parallel>], iteration_bounds = array<i64: 1>, scalar_prefetch = 0 : i64, scratch_operands = 0 : i64, tpu.core_type = #tpu.core_type<tc>, window_params = [{transform_indices = @transform_0, window_bounds = array<i64: 8, 32>}, {pipeline_mode = #tpu.pipeline_mode<synchronous>, transform_indices = @transform_1, window_bounds = array<i64: 3, 32, 32>}, {pipeline_mode = #tpu.pipeline_mode<synchronous>, transform_indices = @transform_2, window_bounds = array<i64: 3, 1, 32>}, {transform_indices = @transform_3, window_bounds = array<i64: 8, 1>}]} {
    %c0 = arith.constant 0 : index
    %c0_0 = arith.constant 0 : index
    %0 = vector.load %arg1[%c0, %c0_0] : memref<8x32xf32, #tpu.memory_space<vmem>>, vector<8x32xf32>
    %c0_1 = arith.constant 0 : index
    %c0_2 = arith.constant 0 : index
    %c0_3 = arith.constant 0 : index
    %1 = vector.load %arg2[%c0_1, %c0_2, %c0_3] : memref<3x32x32xf32, #tpu.memory_space<vmem>>, vector<1x32x32xf32>
    %2 = vector.shape_cast %1 : vector<1x32x32xf32> to vector<32x32xf32>
    %c0_4 = arith.constant 0 : index
    %c0_5 = arith.constant 0 : index
    %c0_6 = arith.constant 0 : index
    %3 = vector.load %arg3[%c0_4, %c0_5, %c0_6] : memref<3x1x32xf32, #tpu.memory_space<vmem>>, vector<1x1x32xf32>
    %4 = vector.shape_cast %3 : vector<1x1x32xf32> to vector<1x32xf32>
    %cst = arith.constant dense<0.000000e+00> : vector<8x32xf32>
    %5 = tpu.matmul %0, %2, %cst {dimension_numbers = #tpu.dot_dimension_numbers<[1], [0], [0], [1], [0, 0, 1, 1], [], []>} : vector<8x32xf32>, vector<32x32xf32>, vector<8x32xf32> -> vector<8x32xf32>
    %6 = vector.broadcast %4 : vector<1x32xf32> to vector<8x32xf32>
    %7 = arith.addf %5, %6 : vector<8x32xf32>
    %cst_7 = arith.constant 0.000000e+00 : f32
    %8 = vector.broadcast %cst_7 : f32 to vector<8x32xf32>
    %9 = arith.maximumf %7, %8 : vector<8x32xf32>
    %c1 = arith.constant 1 : index
    %c0_8 = arith.constant 0 : index
    %c0_9 = arith.constant 0 : index
    %10 = vector.load %arg2[%c1, %c0_8, %c0_9] : memref<3x32x32xf32, #tpu.memory_space<vmem>>, vector<1x32x32xf32>
    %11 = vector.shape_cast %10 : vector<1x32x32xf32> to vector<32x32xf32>
    %c1_10 = arith.constant 1 : index
    %c0_11 = arith.constant 0 : index
    %c0_12 = arith.constant 0 : index
    %12 = vector.load %arg3[%c1_10, %c0_11, %c0_12] : memref<3x1x32xf32, #tpu.memory_space<vmem>>, vector<1x1x32xf32>
    %13 = vector.shape_cast %12 : vector<1x1x32xf32> to vector<1x32xf32>
    %cst_13 = arith.constant dense<0.000000e+00> : vector<8x32xf32>
    %14 = tpu.matmul %9, %11, %cst_13 {dimension_numbers = #tpu.dot_dimension_numbers<[1], [0], [0], [1], [0, 0, 1, 1], [], []>} : vector<8x32xf32>, vector<32x32xf32>, vector<8x32xf32> -> vector<8x32xf32>
    %15 = vector.broadcast %13 : vector<1x32xf32> to vector<8x32xf32>
    %16 = arith.addf %14, %15 : vector<8x32xf32>
    %cst_14 = arith.constant 0.000000e+00 : f32
    %17 = vector.broadcast %cst_14 : f32 to vector<8x32xf32>
    %18 = arith.maximumf %16, %17 : vector<8x32xf32>
    %c2 = arith.constant 2 : index
    %c0_15 = arith.constant 0 : index
    %c0_16 = arith.constant 0 : index
    %19 = vector.load %arg2[%c2, %c0_15, %c0_16] : memref<3x32x32xf32, #tpu.memory_space<vmem>>, vector<1x1x32xf32>
    %20 = vector.shape_cast %19 : vector<1x1x32xf32> to vector<1x32xf32>
    %c2_17 = arith.constant 2 : index
    %c0_18 = arith.constant 0 : index
    %c0_19 = arith.constant 0 : index
    %21 = vector.load %arg3[%c2_17, %c0_18, %c0_19] : memref<3x1x32xf32, #tpu.memory_space<vmem>>, vector<1x1x1xf32>
    %22 = vector.shape_cast %21 : vector<1x1x1xf32> to vector<1x1xf32>
    %23 = vector.broadcast %20 : vector<1x32xf32> to vector<8x32xf32>
    %24 = arith.mulf %18, %23 : vector<8x32xf32>
    %cst_20 = arith.constant dense<0.000000e+00> : vector<8xf32>
    %25 = vector.multi_reduction <add>, %24, %cst_20 [1] : vector<8x32xf32> to vector<8xf32>
    %26 = vector.shape_cast %25 : vector<8xf32> to vector<8x1xf32>
    %27 = vector.broadcast %22 : vector<1x1xf32> to vector<8x1xf32>
    %28 = arith.addf %26, %27 : vector<8x1xf32>
    %c0_21 = arith.constant 0 : index
    %c0_22 = arith.constant 0 : index
    %29 = vector.load %arg4[%c0_21, %c0_22] : memref<8x1xf32, #tpu.memory_space<vmem>>, vector<8x1xf32>
    tpu.vector_store %arg4[%c0_21, %c0_22], %28 {strides = array<i32>} : memref<8x1xf32, #tpu.memory_space<vmem>>, vector<8x1xf32>,
    return
  }
  func.func @transform_0(%arg0: i32) -> (i32, i32) {
    %c0_i32 = arith.constant 0 : i32
    %c0_i32_0 = arith.constant 0 : i32
    return %arg0, %c0_i32 : i32, i32
  }
  func.func @transform_1(%arg0: i32) -> (i32, i32, i32) {
    %c0_i32 = arith.constant 0 : i32
    %c0_i32_0 = arith.constant 0 : i32
    %c0_i32_1 = arith.constant 0 : i32
    %c0_i32_2 = arith.constant 0 : i32
    return %c0_i32, %c0_i32_0, %c0_i32_1 : i32, i32, i32
  }
  func.func @transform_2(%arg0: i32) -> (i32, i32, i32) {
    %c0_i32 = arith.constant 0 : i32
    %c0_i32_0 = arith.constant 0 : i32
    %c0_i32_1 = arith.constant 0 : i32
    %c0_i32_2 = arith.constant 0 : i32
    return %c0_i32, %c0_i32_0, %c0_i32_1 : i32, i32, i32
  }
  func.func @transform_3(%arg0: i32) -> (i32, i32) {
    %c0_i32 = arith.constant 0 : i32
    %c0_i32_0 = arith.constant 0 : i32
    return %arg0, %c0_i32 : i32, i32
  }
}

</mosaic_0001>

<bundles_post_ra>
// kernel: tpu_custom_call.1
= control target key start
LH: loop header
LB: loop body
LE: loop exit
PB: predicated region body
PF: predicated region fallthrough
CT: control target
= control target key end

     0   :  { %8 = vsyncpa [#allocation3], 0  ;;  %s421_s0 = inlined_call_operand.hbm [shape: f32[8,32], index: 0, kind: input, shape index: {}]   ;;  %s422_s1 = inlined_call_operand.hbm [shape: f32[3,32,32], index: 1, kind: input, shape index: {}]   ;;  %s423_s2 = inlined_call_operand.vmem [shape: f32[3,1,32], index: 2, kind: input, shape index: {}]   ;;  %s424_s3 = inlined_call_operand.vmem [shape: f32[8,1], index: 3, kind: output, shape index: {}]  }
   0x1   :  { %9 = vsyncpa [#allocation5], 0  ;;  %s348_s12 = smov [#allocation2]   ;;  %s349_s14 = smov [#allocation4]  }
   0x2   :  { %s16_s13 = sshll.u32 %s348_s12, 4  ;;  %s25_s15 = sshll.u32 %s349_s14, 4  ;;  %s17_s13 = int_to_ptr.vmem [resolvable:$true] %s16_s13  ;;  %s375_s15 = int_to_ptr.vmem [resolvable:$true] %s25_s15 }
   0x3   :  { %s300_s18 = scalar_lea.hbm %s421_s0, 128 }
   0x4   :  { %p301_p0 = scmp.ne.s32.totalorder %s421_s0, %s300_s18  ;;  %p304_p1 = scmp.lt.u32.totalorder %s300_s18, %s421_s0 }
   0x6   :  { %p306_p2 = pnand %p304_p1, %p301_p0 }
   0x8   :  { %309 = shalt.err (!%p306_p2)
}
   0x9   :  { %s310_s23 = scalar_lea.vmem %s17_s13, 128  ;;  %p315_p4 = scmp.lt.s32.totalorder %s17_s13, %s17_s13 }
   0xa   :  { %p311_p3 = scmp.ne.s32.totalorder %s17_s13, %s310_s23  ;;  %p316_p5 = scmp.lt.s32.totalorder %s310_s23, %s310_s23 }
   0xc   :  { %p317_p6 = por %p316_p5, %p315_p4 }
   0xe   :  { %p318_p7 = pnand %p317_p6, %p311_p3 }
  0x10   :  { %321 = shalt.err (!%p318_p7)
}
  0x11   :  { %19 = dma.hbm_to_vmem [thread:$0]  %s421_s0, 128, %s17_s13, [#allocation3]  }
  0x12   :  { %s322_s28 = scalar_lea.hbm %s422_s1, 1536 }
  0x13   :  { %p323_p8 = scmp.ne.s32.totalorder %s422_s1, %s322_s28  ;;  %p326_p9 = scmp.lt.u32.totalorder %s322_s28, %s422_s1 }
  0x15   :  { %p328_p10 = pnand %p326_p9, %p323_p8 }
  0x17   :  { %331 = shalt.err (!%p328_p10)
}
  0x18   :  { %s332_s6 = scalar_lea.vmem %s375_s15, 1536  ;;  %p337_p12 = scmp.lt.s32.totalorder %s375_s15, %s375_s15 }
  0x19   :  { %p333_p11 = scmp.ne.s32.totalorder %s375_s15, %s332_s6  ;;  %p338_p13 = scmp.lt.s32.totalorder %s332_s6, %s332_s6 }
  0x1b   :  { %p339_p0 = por %p338_p13, %p337_p12 }
  0x1d   :  { %p340_p1 = pnand %p339_p0, %p333_p11 }
  0x1f   :  { %343 = shalt.err (!%p340_p1)
}
  0x20   :  { %s350_s0 = smov 128   ;;  %s351_s7 = smov 8  }
  0x21   :  { %31 = dma.hbm_to_vmem [thread:$0]  %s422_s1, 1536, %s375_s15, [#allocation5], %s350_s0, %s350_s0, %s351_s7  }
  0x22   :  { %344 = dma.done.wait [#allocation3], 128  }
  0x23   :  { %345 = vsyncadd [#allocation3], 4294967168 }
  0x24   :  { %346 = dma.done.wait [#allocation5], 1536  }
  0x25   :  { %347 = vsyncadd [#allocation5], 4294965760  ;;  %v352_v0 = vmov 0.0|0.0   ;;  %vm353_vm0 = vmmov 0   ;;  %v354_v1 = vmov 0.0   ;;  %v41_v2 = vld [vmem:[#allocation4] sm:$0xff] }
  0x26   :  { %281 = vmatprep.subr.bf16.mxu0 %v352_v0  ;;  %267 = vmatprep.mubr.msk.f32.mxu0 %vm353_vm0, %v354_v1  ;;  %v42_v3 = vld [vmem:[#allocation4 + $0x8] sm:$0xff]  ;;  %v43_v4 = vld [vmem:[#allocation4 + $0x10] sm:$0xff]  ;;  %v44_v6 = vld [vmem:[#allocation4 + $0x18] sm:$0xff]  ;;  %vm52_vm1 = vcmask 261120   ;;  %vm233_vm2 = vcmask 7168  }
  0x27   :  { %287 = vmatprep.subr.bf16.mxu1 %v352_v0  ;;  %278 = vmatprep.mubr.msk.f32.mxu1 %vm353_vm0, %v354_v1  ;;  %v282_v5 = vpack.c.bf16 %v42_v3, %v41_v2  ;;  %v128_v7 = vld [vmem:[#allocation4 + $0x20] sm:$0xff]  ;;  %v129_v8 = vld [vmem:[#allocation4 + $0x28] sm:$0xff]  ;;  %v285_v9 = vpack.c.bf16 %v44_v6, %v43_v4  ;;  %v40_v11 = vld [vmem:[#allocation2] sm:$0xff] }
  0x28   :  { %v288_v10 = vpack.c.bf16 %v129_v8, %v128_v7  ;;  %v130_v12 = vld [vmem:[#allocation4 + $0x30] sm:$0xff]  ;;  %v131_v13 = vld [vmem:[#allocation4 + $0x38] sm:$0xff]  ;;  %v247_v24 = vld [vmem:[#allocation4 + $0x40] ss:$0 sm:$0xff] }
  0x29   :  { %283 = vmatpush3.bf16.msra.mxu0 %v282_v5  ;;  %v291_v14 = vpack.c.bf16 %v131_v13, %v130_v12  ;;  %v241_v15 = vld [vmem:[%s423_s2] ss:$0 sm:$0xff]  ;;  %v244_v20 = vld [vmem:[%s423_s2 + $0x1] ss:$0 sm:$0xff]  ;;  %v248_v28 = vld [vmem:[%s423_s2 + $0x2] ss:$0 sm:$0xff] }
  0x2a   :  { %284 = vmatprep.subr.bf16.mxu0 %v352_v0  ;;  %289 = vmatpush3.bf16.msra.mxu1 %v288_v10 }
  0x2b   :  { %290 = vmatprep.subr.bf16.mxu1 %v352_v0 }
  0x2d   :  { %286 = vmatpush3.bf16.msra.mxu0 %v285_v9 }
  0x2e   :  { %292 = vmatpush3.bf16.msra.mxu1 %v291_v14 }
  0x30   :  { %268 = vmatmul.mubr.msk.f32.vlgmr.msra.gmra.mrb[0].mxu0 %vm52_vm1, %v40_v11 }
 0x103   :  { %v122_v16 = vpop.f32.mrb[0].mxu0 }
 0x104   :  { %v123_v17 = vadd.f32 %v241_v15, %v122_v16  ;;  %v269_v18 = vpop.f32.mrb[1].mxu0 }
 0x106   :  { %v126_v19 = vmax.f32 %v123_v17, 0.0 }
 0x108   :  { %279 = vmatmul.mubr.msk.f32.vlgmr.msra.gmra.mrb[0].mxu1 %vm52_vm1, %v126_v19 }
 0x1db   :  { %v209_v21 = vpop.f32.mrb[0].mxu1 }
 0x1dc   :  { %v210_v22 = vadd.f32 %v244_v20, %v209_v21  ;;  %v280_v23 = vpop.f32.mrb[1].mxu1 }
 0x1de   :  { %v213_v25 = vmax.f32 %v210_v22, 0.0 }
 0x1e0   :  { %v222_v26 = vmul.f32 %v247_v24, %v213_v25 }
 0x1e2   :  { %v223_v27 = vsel %vm52_vm1, %v222_v26, 0.0 }
 0x1e3   :  { %224 = vadd.xlane.f32.xlu0 %v223_v27 }
 0x270   :  { %v225_v29 = vpop.xlane.xlu0 %224 }
 0x271   :  { %v232_v30 = vadd.f32 %v248_v28, %v225_v29 }
 0x273   :  { %234 = vst.msk [vmem:[%s424_s3] sm:$0xff] %vm233_vm2, %v232_v30 }
 0x274   :  { %239 = vsyncpa [#allocation3], 1 }
 0x275   :  { %240 = vsyncpa [#allocation5], 1 }

</bundles_post_ra>
